<compile_context>
chip_gen: v7x
topology: tpu7x:2x2x1
jax: 0.10.0
libtpu: 0.0.40
codegen_flags: <defaults>
</compile_context>

<pallas_src>
import jax
import jax.numpy as jnp
from jax.experimental import pallas as pl
from jax.experimental.pallas import tpu as pltpu


def sae_kernel(x_ref,
               w1_ref, b1_ref, w2_ref, b2_ref, w3_ref, b3_ref,
               w4_ref, b4_ref, w5_ref, b5_ref, w6_ref, b6_ref,
               o_ref):
    """Activations are [features, TB] (batch on lanes). Weights are [out, in]."""

    def sigmoid(z):
        # Single-transcendental sigmoid: one EUP tanh push + cheap VPU ops.
        return 0.5 * jnp.tanh(0.5 * z) + 0.5

    def layer(w_ref, b_ref, h, activate):
        y = jnp.dot(w_ref[...], h, preferred_element_type=jnp.float32) + b_ref[...]
        return sigmoid(y) if activate else y

    h = x_ref[...].astype(jnp.float32)
    # encoder
    h = layer(w1_ref, b1_ref, h, True)
    h = layer(w2_ref, b2_ref, h, True)
    h = layer(w3_ref, b3_ref, h, True)
    # decoder
    h = layer(w4_ref, b4_ref, h, True)
    h = layer(w5_ref, b5_ref, h, True)
    h = layer(w6_ref, b6_ref, h, False)   # final layer: no activation
    o_ref[...] = h.astype(o_ref.dtype)


def sae_forward(x, params, *, batch_tile=4096):
    """x: [B, F].  params: flat list [w1, b1, ..., w6, b6], wi = [out, in], bi = [out, 1]."""
    B, F = x.shape

    # Choose the batch tile: full array if small, else a large 128-multiple tile.
    if B <= batch_tile:
        TB, Bp = B, B
    else:
        assert batch_tile % 128 == 0, "batch_tile must be a multiple of 128"
        TB = batch_tile
        Bp = pl.cdiv(B, TB) * TB

    # Lane-dense layout: batch on the lane (last) axis.
    xT = x.T                                            # [F, B]
    if Bp != B:
        xT = jnp.pad(xT, ((0, 0), (0, Bp - B)))         # zero-pad the lane axis

    grid = (Bp // TB,)

    # Cost estimate: 6 matmuls + 5 sigmoids per batch row.
    dims = [F, 30, 20, 10, 20, 30, F]
    flops = 2 * B * sum(dims[i] * dims[i + 1] for i in range(6))
    transcendentals = B * sum(dims[1:6])
    bytes_accessed = 2 * B * F * x.dtype.itemsize + sum(
        p.size * p.dtype.itemsize for p in params)
    cost = pl.CostEstimate(flops=flops,
                           transcendentals=transcendentals,
                           bytes_accessed=bytes_accessed)

    io_spec = pl.BlockSpec((F, TB), lambda i: (0, i))
    # Weights/biases: full-array blocks, constant index_map -> VMEM-resident.
    param_specs = [pl.BlockSpec(p.shape, lambda i: (0, 0)) for p in params]

    outT = pl.pallas_call(
        sae_kernel,
        out_shape=jax.ShapeDtypeStruct((F, Bp), jnp.float32),
        grid=grid,
        in_specs=[io_spec] + param_specs,
        out_specs=io_spec,
        compiler_params=pltpu.CompilerParams(
            dimension_semantics=("parallel",)),
        cost_estimate=cost,
    )(xT, *params)

    return outT.T[:B]                                   # back to [B, F]


def init_params(key, nb_neurons):
    """PyTorch nn.Linear-style init (U[-k, k], k = 1/sqrt(fan_in)).

    Weights stored PyTorch-native [out, in]; biases stored [out, 1]."""
    dims = [nb_neurons, 30, 20, 10, 20, 30, nb_neurons]
    params = []
    for i in range(6):
        fan_in, fan_out = dims[i], dims[i + 1]
        key, kw, kb = jax.random.split(key, 3)
        bound = 1.0 / jnp.sqrt(float(fan_in))
        w = jax.random.uniform(kw, (fan_out, fan_in), jnp.float32,
                               minval=-bound, maxval=bound)
        b = jax.random.uniform(kb, (fan_out, 1), jnp.float32,
                               minval=-bound, maxval=bound)
        params.extend([w, b])
    return params


def sae_reference(x, params):
    """Pure-JAX reference matching the PyTorch forward."""
    h = x
    for i in range(6):
        w, b = params[2 * i], params[2 * i + 1]
        h = h @ w.T + b[:, 0]
        if i < 5:
            h = jax.nn.sigmoid(h)
    return h


if __name__ == "__main__":
    nb_neurons = 32   # stand-in for training_set.shape[1]

    key = jax.random.PRNGKey(0)
    key, kx_small, kx_big = jax.random.split(key, 3)
    params = init_params(key, nb_neurons)

    # Small, spec-like batch (single grid step, full-array block).
    x_small = jax.random.normal(kx_small, (8, nb_neurons), jnp.float32)
    out_small = jax.block_until_ready(sae_forward(x_small, params))
    ref_small = sae_reference(x_small, params)
    assert out_small.shape == x_small.shape
    assert jnp.allclose(out_small, ref_small, atol=1e-4, rtol=1e-5)

    # Larger batch exercising the batch grid (4 tiles of 128 lanes each).
    x_big = jax.random.normal(kx_big, (512, nb_neurons), jnp.float32)
    out_big = jax.block_until_ready(sae_forward(x_big, params, batch_tile=128))
    ref_big = sae_reference(x_big, params)
    assert out_big.shape == x_big.shape
    assert jnp.allclose(out_big, ref_big, atol=1e-4, rtol=1e-5)

    print("KERNEL_OK")
</pallas_src>

<mosaic_0001>
module attributes {stable_mosaic.version = 11 : i64} {
  func.func @sae_kernel(%arg0: i32, %arg1: memref<32x8xf32, #tpu.memory_space<vmem>>, %arg2: memref<30x32xf32, #tpu.memory_space<vmem>>, %arg3: memref<30x1xf32, #tpu.memory_space<vmem>>, %arg4: memref<20x30xf32, #tpu.memory_space<vmem>>, %arg5: memref<20x1xf32, #tpu.memory_space<vmem>>, %arg6: memref<10x20xf32, #tpu.memory_space<vmem>>, %arg7: memref<10x1xf32, #tpu.memory_space<vmem>>, %arg8: memref<20x10xf32, #tpu.memory_space<vmem>>, %arg9: memref<20x1xf32, #tpu.memory_space<vmem>>, %arg10: memref<30x20xf32, #tpu.memory_space<vmem>>, %arg11: memref<30x1xf32, #tpu.memory_space<vmem>>, %arg12: memref<32x30xf32, #tpu.memory_space<vmem>>, %arg13: memref<32x1xf32, #tpu.memory_space<vmem>>, %arg14: memref<32x8xf32, #tpu.memory_space<vmem>>) attributes {dimension_semantics = [#tpu.dimension_semantics<parallel>], iteration_bounds = array<i64: 1>, scalar_prefetch = 0 : i64, scratch_operands = 0 : i64, tpu.core_type = #tpu.core_type<tc>, window_params = [{transform_indices = @transform_0, window_bounds = array<i64: 32, 8>}, {pipeline_mode = #tpu.pipeline_mode<synchronous>, transform_indices = @transform_1, window_bounds = array<i64: 30, 32>}, {pipeline_mode = #tpu.pipeline_mode<synchronous>, transform_indices = @transform_2, window_bounds = array<i64: 30, 1>}, {pipeline_mode = #tpu.pipeline_mode<synchronous>, transform_indices = @transform_3, window_bounds = array<i64: 20, 30>}, {pipeline_mode = #tpu.pipeline_mode<synchronous>, transform_indices = @transform_4, window_bounds = array<i64: 20, 1>}, {pipeline_mode = #tpu.pipeline_mode<synchronous>, transform_indices = @transform_5, window_bounds = array<i64: 10, 20>}, {pipeline_mode = #tpu.pipeline_mode<synchronous>, transform_indices = @transform_6, window_bounds = array<i64: 10, 1>}, {pipeline_mode = #tpu.pipeline_mode<synchronous>, transform_indices = @transform_7, window_bounds = array<i64: 20, 10>}, {pipeline_mode = #tpu.pipeline_mode<synchronous>, transform_indices = @transform_8, window_bounds = array<i64: 20, 1>}, {pipeline_mode = #tpu.pipeline_mode<synchronous>, transform_indices = @transform_9, window_bounds = array<i64: 30, 20>}, {pipeline_mode = #tpu.pipeline_mode<synchronous>, transform_indices = @transform_10, window_bounds = array<i64: 30, 1>}, {pipeline_mode = #tpu.pipeline_mode<synchronous>, transform_indices = @transform_11, window_bounds = array<i64: 32, 30>}, {pipeline_mode = #tpu.pipeline_mode<synchronous>, transform_indices = @transform_12, window_bounds = array<i64: 32, 1>}, {transform_indices = @transform_13, window_bounds = array<i64: 32, 8>}]} {
    %c0 = arith.constant 0 : index
    %c0_0 = arith.constant 0 : index
    %0 = vector.load %arg1[%c0, %c0_0] : memref<32x8xf32, #tpu.memory_space<vmem>>, vector<32x8xf32>
    %c0_1 = arith.constant 0 : index
    %c0_2 = arith.constant 0 : index
    %1 = vector.load %arg2[%c0_1, %c0_2] : memref<30x32xf32, #tpu.memory_space<vmem>>, vector<30x32xf32>
    %cst = arith.constant dense<0.000000e+00> : vector<30x8xf32>
    %2 = tpu.matmul %1, %0, %cst {dimension_numbers = #tpu.dot_dimension_numbers<[1], [0], [0], [1], [0, 0, 1, 1], [], []>} : vector<30x32xf32>, vector<32x8xf32>, vector<30x8xf32> -> vector<30x8xf32>
    %c0_3 = arith.constant 0 : index
    %c0_4 = arith.constant 0 : index
    %3 = vector.load %arg3[%c0_3, %c0_4] : memref<30x1xf32, #tpu.memory_space<vmem>>, vector<30x1xf32>
    %4 = vector.broadcast %3 : vector<30x1xf32> to vector<30x8xf32>
    %5 = arith.addf %2, %4 : vector<30x8xf32>
    %cst_5 = arith.constant 5.000000e-01 : f32
    %6 = vector.broadcast %cst_5 : f32 to vector<30x8xf32>
    %7 = arith.mulf %6, %5 : vector<30x8xf32>
    %8 = math.tanh %7 : vector<30x8xf32>
    %cst_6 = arith.constant 5.000000e-01 : f32
    %9 = vector.broadcast %cst_6 : f32 to vector<30x8xf32>
    %10 = arith.mulf %9, %8 : vector<30x8xf32>
    %cst_7 = arith.constant 5.000000e-01 : f32
    %11 = vector.broadcast %cst_7 : f32 to vector<30x8xf32>
    %12 = arith.addf %10, %11 : vector<30x8xf32>
    %c0_8 = arith.constant 0 : index
    %c0_9 = arith.constant 0 : index
    %13 = vector.load %arg4[%c0_8, %c0_9] : memref<20x30xf32, #tpu.memory_space<vmem>>, vector<20x30xf32>
    %cst_10 = arith.constant dense<0.000000e+00> : vector<20x8xf32>
    %14 = tpu.matmul %13, %12, %cst_10 {dimension_numbers = #tpu.dot_dimension_numbers<[1], [0], [0], [1], [0, 0, 1, 1], [], []>} : vector<20x30xf32>, vector<30x8xf32>, vector<20x8xf32> -> vector<20x8xf32>
    %c0_11 = arith.constant 0 : index
    %c0_12 = arith.constant 0 : index
    %15 = vector.load %arg5[%c0_11, %c0_12] : memref<20x1xf32, #tpu.memory_space<vmem>>, vector<20x1xf32>
    %16 = vector.broadcast %15 : vector<20x1xf32> to vector<20x8xf32>
    %17 = arith.addf %14, %16 : vector<20x8xf32>
    %cst_13 = arith.constant 5.000000e-01 : f32
    %18 = vector.broadcast %cst_13 : f32 to vector<20x8xf32>
    %19 = arith.mulf %18, %17 : vector<20x8xf32>
    %20 = math.tanh %19 : vector<20x8xf32>
    %cst_14 = arith.constant 5.000000e-01 : f32
    %21 = vector.broadcast %cst_14 : f32 to vector<20x8xf32>
    %22 = arith.mulf %21, %20 : vector<20x8xf32>
    %cst_15 = arith.constant 5.000000e-01 : f32
    %23 = vector.broadcast %cst_15 : f32 to vector<20x8xf32>
    %24 = arith.addf %22, %23 : vector<20x8xf32>
    %c0_16 = arith.constant 0 : index
    %c0_17 = arith.constant 0 : index
    %25 = vector.load %arg6[%c0_16, %c0_17] : memref<10x20xf32, #tpu.memory_space<vmem>>, vector<10x20xf32>
    %cst_18 = arith.constant dense<0.000000e+00> : vector<10x8xf32>
    %26 = tpu.matmul %25, %24, %cst_18 {dimension_numbers = #tpu.dot_dimension_numbers<[1], [0], [0], [1], [0, 0, 1, 1], [], []>} : vector<10x20xf32>, vector<20x8xf32>, vector<10x8xf32> -> vector<10x8xf32>
    %c0_19 = arith.constant 0 : index
    %c0_20 = arith.constant 0 : index
    %27 = vector.load %arg7[%c0_19, %c0_20] : memref<10x1xf32, #tpu.memory_space<vmem>>, vector<10x1xf32>
    %28 = vector.broadcast %27 : vector<10x1xf32> to vector<10x8xf32>
    %29 = arith.addf %26, %28 : vector<10x8xf32>
    %cst_21 = arith.constant 5.000000e-01 : f32
    %30 = vector.broadcast %cst_21 : f32 to vector<10x8xf32>
    %31 = arith.mulf %30, %29 : vector<10x8xf32>
    %32 = math.tanh %31 : vector<10x8xf32>
    %cst_22 = arith.constant 5.000000e-01 : f32
    %33 = vector.broadcast %cst_22 : f32 to vector<10x8xf32>
    %34 = arith.mulf %33, %32 : vector<10x8xf32>
    %cst_23 = arith.constant 5.000000e-01 : f32
    %35 = vector.broadcast %cst_23 : f32 to vector<10x8xf32>
    %36 = arith.addf %34, %35 : vector<10x8xf32>
    %c0_24 = arith.constant 0 : index
    %c0_25 = arith.constant 0 : index
    %37 = vector.load %arg8[%c0_24, %c0_25] : memref<20x10xf32, #tpu.memory_space<vmem>>, vector<20x10xf32>
    %cst_26 = arith.constant dense<0.000000e+00> : vector<20x8xf32>
    %38 = tpu.matmul %37, %36, %cst_26 {dimension_numbers = #tpu.dot_dimension_numbers<[1], [0], [0], [1], [0, 0, 1, 1], [], []>} : vector<20x10xf32>, vector<10x8xf32>, vector<20x8xf32> -> vector<20x8xf32>
    %c0_27 = arith.constant 0 : index
    %c0_28 = arith.constant 0 : index
    %39 = vector.load %arg9[%c0_27, %c0_28] : memref<20x1xf32, #tpu.memory_space<vmem>>, vector<20x1xf32>
    %40 = vector.broadcast %39 : vector<20x1xf32> to vector<20x8xf32>
    %41 = arith.addf %38, %40 : vector<20x8xf32>
    %cst_29 = arith.constant 5.000000e-01 : f32
    %42 = vector.broadcast %cst_29 : f32 to vector<20x8xf32>
    %43 = arith.mulf %42, %41 : vector<20x8xf32>
    %44 = math.tanh %43 : vector<20x8xf32>
    %cst_30 = arith.constant 5.000000e-01 : f32
    %45 = vector.broadcast %cst_30 : f32 to vector<20x8xf32>
    %46 = arith.mulf %45, %44 : vector<20x8xf32>
    %cst_31 = arith.constant 5.000000e-01 : f32
    %47 = vector.broadcast %cst_31 : f32 to vector<20x8xf32>
    %48 = arith.addf %46, %47 : vector<20x8xf32>
    %c0_32 = arith.constant 0 : index
    %c0_33 = arith.constant 0 : index
    %49 = vector.load %arg10[%c0_32, %c0_33] : memref<30x20xf32, #tpu.memory_space<vmem>>, vector<30x20xf32>
    %cst_34 = arith.constant dense<0.000000e+00> : vector<30x8xf32>
    %50 = tpu.matmul %49, %48, %cst_34 {dimension_numbers = #tpu.dot_dimension_numbers<[1], [0], [0], [1], [0, 0, 1, 1], [], []>} : vector<30x20xf32>, vector<20x8xf32>, vector<30x8xf32> -> vector<30x8xf32>
    %c0_35 = arith.constant 0 : index
    %c0_36 = arith.constant 0 : index
    %51 = vector.load %arg11[%c0_35, %c0_36] : memref<30x1xf32, #tpu.memory_space<vmem>>, vector<30x1xf32>
    %52 = vector.broadcast %51 : vector<30x1xf32> to vector<30x8xf32>
    %53 = arith.addf %50, %52 : vector<30x8xf32>
    %cst_37 = arith.constant 5.000000e-01 : f32
    %54 = vector.broadcast %cst_37 : f32 to vector<30x8xf32>
    %55 = arith.mulf %54, %53 : vector<30x8xf32>
    %56 = math.tanh %55 : vector<30x8xf32>
    %cst_38 = arith.constant 5.000000e-01 : f32
    %57 = vector.broadcast %cst_38 : f32 to vector<30x8xf32>
    %58 = arith.mulf %57, %56 : vector<30x8xf32>
    %cst_39 = arith.constant 5.000000e-01 : f32
    %59 = vector.broadcast %cst_39 : f32 to vector<30x8xf32>
    %60 = arith.addf %58, %59 : vector<30x8xf32>
    %c0_40 = arith.constant 0 : index
    %c0_41 = arith.constant 0 : index
    %61 = vector.load %arg12[%c0_40, %c0_41] : memref<32x30xf32, #tpu.memory_space<vmem>>, vector<32x30xf32>
    %cst_42 = arith.constant dense<0.000000e+00> : vector<32x8xf32>
    %62 = tpu.matmul %61, %60, %cst_42 {dimension_numbers = #tpu.dot_dimension_numbers<[1], [0], [0], [1], [0, 0, 1, 1], [], []>} : vector<32x30xf32>, vector<30x8xf32>, vector<32x8xf32> -> vector<32x8xf32>
    %c0_43 = arith.constant 0 : index
    %c0_44 = arith.constant 0 : index
    %63 = vector.load %arg13[%c0_43, %c0_44] : memref<32x1xf32, #tpu.memory_space<vmem>>, vector<32x1xf32>
    %64 = vector.broadcast %63 : vector<32x1xf32> to vector<32x8xf32>
    %65 = arith.addf %62, %64 : vector<32x8xf32>
    %c0_45 = arith.constant 0 : index
    %c0_46 = arith.constant 0 : index
    %66 = vector.load %arg14[%c0_45, %c0_46] : memref<32x8xf32, #tpu.memory_space<vmem>>, vector<32x8xf32>
    tpu.vector_store %arg14[%c0_45, %c0_46], %65 {strides = array<i32>} : memref<32x8xf32, #tpu.memory_space<vmem>>, vector<32x8xf32>,
    return
  }
  func.func @transform_0(%arg0: i32) -> (i32, i32) {
    %c0_i32 = arith.constant 0 : i32
    %c0_i32_0 = arith.constant 0 : i32
    return %c0_i32, %arg0 : i32, i32
  }
  func.func @transform_1(%arg0: i32) -> (i32, i32) {
    %c0_i32 = arith.constant 0 : i32
    %c0_i32_0 = arith.constant 0 : i32
    %c0_i32_1 = arith.constant 0 : i32
    return %c0_i32, %c0_i32_0 : i32, i32
  }
  func.func @transform_2(%arg0: i32) -> (i32, i32) {
    %c0_i32 = arith.constant 0 : i32
    %c0_i32_0 = arith.constant 0 : i32
    %c0_i32_1 = arith.constant 0 : i32
    return %c0_i32, %c0_i32_0 : i32, i32
  }
  func.func @transform_3(%arg0: i32) -> (i32, i32) {
    %c0_i32 = arith.constant 0 : i32
    %c0_i32_0 = arith.constant 0 : i32
    %c0_i32_1 = arith.constant 0 : i32
    return %c0_i32, %c0_i32_0 : i32, i32
  }
  func.func @transform_4(%arg0: i32) -> (i32, i32) {
    %c0_i32 = arith.constant 0 : i32
    %c0_i32_0 = arith.constant 0 : i32
    %c0_i32_1 = arith.constant 0 : i32
    return %c0_i32, %c0_i32_0 : i32, i32
  }
  func.func @transform_5(%arg0: i32) -> (i32, i32) {
    %c0_i32 = arith.constant 0 : i32
    %c0_i32_0 = arith.constant 0 : i32
    %c0_i32_1 = arith.constant 0 : i32
    return %c0_i32, %c0_i32_0 : i32, i32
  }
  func.func @transform_6(%arg0: i32) -> (i32, i32) {
    %c0_i32 = arith.constant 0 : i32
    %c0_i32_0 = arith.constant 0 : i32
    %c0_i32_1 = arith.constant 0 : i32
    return %c0_i32, %c0_i32_0 : i32, i32
  }
  func.func @transform_7(%arg0: i32) -> (i32, i32) {
    %c0_i32 = arith.constant 0 : i32
    %c0_i32_0 = arith.constant 0 : i32
    %c0_i32_1 = arith.constant 0 : i32
    return %c0_i32, %c0_i32_0 : i32, i32
  }
  func.func @transform_8(%arg0: i32) -> (i32, i32) {
    %c0_i32 = arith.constant 0 : i32
    %c0_i32_0 = arith.constant 0 : i32
    %c0_i32_1 = arith.constant 0 : i32
    return %c0_i32, %c0_i32_0 : i32, i32
  }
  func.func @transform_9(%arg0: i32) -> (i32, i32) {
    %c0_i32 = arith.constant 0 : i32
    %c0_i32_0 = arith.constant 0 : i32
    %c0_i32_1 = arith.constant 0 : i32
    return %c0_i32, %c0_i32_0 : i32, i32
  }
  func.func @transform_10(%arg0: i32) -> (i32, i32) {
    %c0_i32 = arith.constant 0 : i32
    %c0_i32_0 = arith.constant 0 : i32
    %c0_i32_1 = arith.constant 0 : i32
    return %c0_i32, %c0_i32_0 : i32, i32
  }
  func.func @transform_11(%arg0: i32) -> (i32, i32) {
    %c0_i32 = arith.constant 0 : i32
    %c0_i32_0 = arith.constant 0 : i32
    %c0_i32_1 = arith.constant 0 : i32
    return %c0_i32, %c0_i32_0 : i32, i32
  }
  func.func @transform_12(%arg0: i32) -> (i32, i32) {
    %c0_i32 = arith.constant 0 : i32
    %c0_i32_0 = arith.constant 0 : i32
    %c0_i32_1 = arith.constant 0 : i32
    return %c0_i32, %c0_i32_0 : i32, i32
  }
  func.func @transform_13(%arg0: i32) -> (i32, i32) {
    %c0_i32 = arith.constant 0 : i32
    %c0_i32_0 = arith.constant 0 : i32
    return %c0_i32, %arg0 : i32, i32
  }
}

</mosaic_0001>

<bundles_post_ra>
// kernel: tpu_custom_call.1
= control target key start
LH: loop header
LB: loop body
LE: loop exit
PB: predicated region body
PF: predicated region fallthrough
CT: control target
= control target key end

     0   :  { %vm76_vm0 = vcmask 261120   ;;  %v1053_v3 = vmov 0   ;;  %v1054_v31 = vmov 0.0|0.0   ;;  %vm1055_vm1 = vmmov 0   ;;  %s1320_s0 = inlined_call_operand.vmem [shape: f32[32,8], index: 0, kind: input, shape index: {}]   ;;  %s1321_s1 = inlined_call_operand.vmem [shape: f32[30,32], index: 1, kind: input, shape index: {}]   ;;  %s1322_s2 = inlined_call_operand.vmem [shape: f32[30,1], index: 2, kind: input, shape index: {}]   ;;  %s1323_s4 = inlined_call_operand.vmem [shape: f32[20,1], index: 4, kind: input, shape index: {}]   ;;  %s1324_s6 = inlined_call_operand.vmem [shape: f32[10,1], index: 6, kind: input, shape index: {}]   ;;  %s1325_s8 = inlined_call_operand.vmem [shape: f32[20,1], index: 8, kind: input, shape index: {}]   ;;  %s1326_s10 = inlined_call_operand.vmem [shape: f32[30,1], index: 10, kind: input, shape index: {}]   ;;  %s1327_s12 = inlined_call_operand.vmem [shape: f32[32,1], index: 12, kind: input, shape index: {}]   ;;  %s1328_s3 = inlined_call_operand.vmem [shape: f32[20,30], index: 3, kind: input, shape index: {}]   ;;  %s1329_s5 = inlined_call_operand.vmem [shape: f32[10,20], index: 5, kind: input, shape index: {}]   ;;  %s1330_s7 = inlined_call_operand.vmem [shape: f32[20,10], index: 7, kind: input, shape index: {}]   ;;  %s1331_s9 = inlined_call_operand.vmem [shape: f32[30,20], index: 9, kind: input, shape index: {}]   ;;  %s1332_s11 = inlined_call_operand.vmem [shape: f32[32,30], index: 11, kind: input, shape index: {}]   ;;  %s1333_s13 = inlined_call_operand.vmem [shape: f32[32,8], index: 13, kind: output, shape index: {}]  }
   0x1   :  { %v44_v0 = vld [vmem:[%s1320_s0] sm:$0xff]  ;;  %v45_v1 = vld [vmem:[%s1320_s0 + $0x8] sm:$0xff]  ;;  %v46_v2 = vld [vmem:[%s1320_s0 + $0x10] sm:$0xff]  ;;  %1019 = vset.pattern.permute.xlu0 %v1053_v3  ;;  %1020 = vset.pattern.permute.xlu1 %v1053_v3  ;;  %v1056_v32 = vmov 0.0   ;;  %vm221_vm2 = vcmask 1045504   ;;  %vm1057_vm3 = vmmov 1  }
   0x2   :  { %v977_v4 = vpack.c.bf16 %v45_v1, %v44_v0  ;;  %v47_v5 = vld [vmem:[%s1320_s0 + $0x18] sm:$0xff]  ;;  %v48_v6 = vld [vmem:[%s1321_s1] sm:$0xff]  ;;  %v54_v9 = vld [vmem:[%s1322_s2 + $0x10] sm:$0xff]  ;;  %985 = vmatprep.subr.bf16.mxu1 %v1054_v31  ;;  %920 = vmatprep.mubr.msk.f32.mxu1 %vm1055_vm1, %v1056_v32  ;;  %vm211_vm5 = vcmask 244736   ;;  %vm331_vm6 = vcmask 162816   ;;  %vm338_vm7 = vcmask 1043456  }
   0x3   :  { %v981_v7 = vpack.c.bf16 %v47_v5, %v46_v2  ;;  %906 = vmatprep.mubr.msk.f32.mxu0 %vm76_vm0, %v48_v6  ;;  %v52_v8 = vld [vmem:[%s1322_s2] sm:$0xff]  ;;  %68 = vperm.xlu1 %1020, %v54_v9   ;;  %v53_v10 = vld [vmem:[%s1322_s2 + $0x8] sm:$0xff]  ;;  %v55_v11 = vld [vmem:[%s1322_s2 + $0x18] sm:$0x3f]  ;;  %vm456_vm8 = vcmask 1041408   ;;  %vm446_vm10 = vcmask 80896  }
   0x4   :  { %978 = vmatprep.subr.bf16.mxu0 %v977_v4  ;;  %58 = vperm.xlu0 %1019, %v52_v8   ;;  %v49_v12 = vld [vmem:[%s1321_s1 + $0x8] sm:$0xff]  ;;  %v193_v13 = vld [vmem:[%s1323_s4] sm:$0xff]  ;;  %v50_v14 = vld [vmem:[%s1321_s1 + $0x10] sm:$0xff]  ;;  %vm824_vm11 = vcmask 64512  }
   0x5   :  { %980 = vmatpush3.bf16.msra.mxu0 %v977_v4  ;;  %v194_v15 = vld [vmem:[%s1323_s4 + $0x8] sm:$0xff]  ;;  %v51_v16 = vld [vmem:[%s1321_s1 + $0x18] sm:$0x3f]  ;;  %v195_v17 = vld [vmem:[%s1323_s4 + $0x10] sm:$0xf] }
   0x6   :  { %982 = vmatprep.subr.bf16.mxu0 %v981_v7  ;;  %v319_v18 = vld [vmem:[%s1324_s6] sm:$0xff]  ;;  %v320_v19 = vld [vmem:[%s1324_s6 + $0x8] sm:$0x3]  ;;  %v430_v22 = vld [vmem:[%s1325_s8 + $0x10] sm:$0xf] }
   0x7   :  { %73 = vperm.xlu1 %1020, %v55_v11   ;;  %v428_v20 = vld [vmem:[%s1325_s8] sm:$0xff]  ;;  %v429_v21 = vld [vmem:[%s1325_s8 + $0x8] sm:$0xff]  ;;  %v558_v25 = vld [vmem:[%s1326_s10 + $0x10] sm:$0xff] }
   0x8   :  { %63 = vperm.xlu0 %1019, %v53_v10   ;;  %v556_v23 = vld [vmem:[%s1326_s10] sm:$0xff]  ;;  %v557_v24 = vld [vmem:[%s1326_s10 + $0x8] sm:$0xff]  ;;  %v559_v26 = vld [vmem:[%s1326_s10 + $0x18] sm:$0x3f] }
   0x9   :  { %984 = vmatpush3.bf16.msra.mxu0 %v981_v7  ;;  %v700_v27 = vld [vmem:[%s1327_s12] sm:$0xff]  ;;  %v701_v28 = vld [vmem:[%s1327_s12 + $0x8] sm:$0xff]  ;;  %v702_v29 = vld [vmem:[%s1327_s12 + $0x10] sm:$0xff] }
   0xa   :  { %v703_v30 = vld [vmem:[%s1327_s12 + $0x18] sm:$0xff]  ;;  %vm1221_vm4 = vmpackc.low %vm221_vm2, %vm1057_vm3  ;;  %v190_v0 = vld [vmem:[%s1328_s3] sm:$0xff] }
   0xb   :  { %203 = vperm.xlu1 %1020, %v194_v15   ;;  %v191_v1 = vld [vmem:[%s1328_s3 + $0x8] sm:$0xff]  ;;  %v192_v2 = vld [vmem:[%s1328_s3 + $0x10] sm:$0xf]  ;;  %v317_v3 = vld [vmem:[%s1329_s5] sm:$0xff] }
   0xc   :  { %907 = vmatmul.mubr.msk.f32.vlgmr.msra.gmra.mrb[0].mxu0 %vm76_vm0, %v49_v12  ;;  %198 = vperm.xlu0 %1019, %v193_v13   ;;  %vm998_vm9 = vmpackc.low %vm456_vm8, %vm1057_vm3 }
   0xd   :  { %909 = vmatprep.mubr.msk.f32.mxu0 %vm76_vm0, %v50_v14 }
   0xf   :  { %323 = vperm.xlu1 %1020, %v319_v18  }
  0x10   :  { %910 = vmatmul.mubr.msk.f32.gmra.mrb[2].mxu0 %vm76_vm0, %v51_v16  ;;  %208 = vperm.xlu0 %1019, %v195_v17  }
  0x11   :  { %935 = vmatprep.mubr.msk.f32.mxu0 %vm331_vm6, %v317_v3 }
  0x13   :  { %433 = vperm.xlu1 %1020, %v428_v20  }
  0x14   :  { %328 = vperm.xlu0 %1019, %v320_v19  }
  0x17   :  { %443 = vperm.xlu1 %1020, %v430_v22  }
  0x18   :  { %438 = vperm.xlu0 %1019, %v429_v21  }
  0x1b   :  { %567 = vperm.xlu1 %1020, %v557_v24  }
  0x1c   :  { %562 = vperm.xlu0 %1019, %v556_v23  }
  0x1f   :  { %577 = vperm.xlu1 %1020, %v559_v26  }
  0x20   :  { %572 = vperm.xlu0 %1019, %v558_v25  }
  0x23   :  { %711 = vperm.xlu1 %1020, %v701_v28  }
  0x24   :  { %706 = vperm.xlu0 %1019, %v700_v27  }
  0x27   :  { %721 = vperm.xlu1 %1020, %v703_v30  }
  0x28   :  { %716 = vperm.xlu0 %1019, %v702_v29   ;;  %v318_v29 = vld [vmem:[%s1329_s5 + $0x8] sm:$0x3] }
  0x82   :  { %v69_v34 = vpop.permute.xlu1 %68 }
  0x83   :  { %v59_v33 = vpop.permute.xlu0 %58 }
  0x86   :  { %v74_v41 = vpop.permute.xlu1 %73 }
  0x87   :  { %v64_v35 = vpop.permute.xlu0 %63 }
  0x8a   :  { %v204_v9 = vpop.permute.xlu1 %203 }
  0x8b   :  { %v199_v4 = vpop.permute.xlu0 %198 }
  0x8f   :  { %v209_v14 = vpop.permute.xlu0 %208 }
  0x93   :  { %v329_v30 = vpop.permute.xlu0 %328 }
  0xdf   :  { %v908_v36 = vpop.f32.mrb[0].mxu0 }
  0xe0   :  { %v161_v37 = vadd.f32 %v908_v36, %v64_v35  ;;  %v155_v38 = vpop.f32.mrb[1].mxu0 }
  0xe1   :  { %v156_v39 = vadd.f32 %v155_v38, %v59_v33 }
  0xe2   :  { %v175_v40 = vmul.f32 0.5, %v161_v37 }
  0xe3   :  { %v174_v42 = vmul.f32 0.5, %v156_v39  ;;  %v911_v43 = vpop.f32.mrb[2].mxu0 }
  0xe4   :  { %1021 = vtanh.f32 %v175_v40  ;;  %v171_v44 = vadd.f32 %v911_v43, %v74_v41  ;;  %v165_v45 = vpop.f32.mrb[3].mxu0 }
  0xe5   :  { %1023 = vtanh.f32 %v174_v42  ;;  %v166_v46 = vadd.f32 %v165_v45, %v69_v34  ;;  %v324_v34 = vpop.permute.xlu1 %323 }
  0xe6   :  { %v177_v47 = vmul.f32 0.5, %v171_v44 }
  0xe7   :  { %v176_v48 = vmul.f32 0.5, %v166_v46  ;;  %v425_v46 = vld [vmem:[%s1330_s7] sm:$0xff] }
  0xe8   :  { %1025 = vtanh.f32 %v177_v47  ;;  %v426_v47 = vld [vmem:[%s1330_s7 + $0x8] sm:$0xff] }
  0xe9   :  { %1027 = vtanh.f32 %v176_v48  ;;  %v427_v48 = vld [vmem:[%s1330_s7 + $0x10] sm:$0xf] }
  0xee   :  { %v1022_v49 = vpop.eup %1021 }
  0xef   :  { %v1024_v50 = vpop.eup %1023  ;;  %v183_v51 = vmul.f32 0.5, %v1022_v49  ;;  %v552_v49 = vld [vmem:[%s1331_s9] sm:$0xff] }
  0xf0   :  { %v182_v52 = vmul.f32 0.5, %v1024_v50  ;;  %v434_v50 = vpop.permute.xlu1 %433 }
  0xf1   :  { %v187_v53 = vadd.f32 0.5, %v183_v51 }
  0xf2   :  { %v1026_v54 = vpop.eup %1025  ;;  %v186_v55 = vadd.f32 0.5, %v182_v52 }
  0xf3   :  { %v1028_v56 = vpop.eup %1027  ;;  %v185_v57 = vmul.f32 0.5, %v1026_v54 }
  0xf4   :  { %v184_v58 = vmul.f32 0.5, %v1028_v56  ;;  %v986_v59 = vpack.c.bf16 %v187_v53, %v186_v55  ;;  %v439_v55 = vpop.permute.xlu0 %438 }
  0xf5   :  { %v189_v60 = vadd.f32 0.5, %v185_v57 }
  0xf6   :  { %v188_v61 = vadd.f32 0.5, %v184_v58  ;;  %987 = vmatpush3.bf16.msra.mxu1 %v986_v59  ;;  %v444_v59 = vpop.permute.xlu1 %443 }
  0xf7   :  { %988 = vmatprep.subr.bf16.mxu1 %v1054_v31 }
  0xf8   :  { %v989_v63 = vpack.c.bf16 %v189_v60, %v188_v61 }
  0xfa   :  { %991 = vmatpush3.bf16.msk.msra.mxu1 %vm1221_vm4, %v989_v63 }
  0xfd   :  { %921 = vmatmul.mubr.msk.f32.vlgmr.msra.gmra.mrb[0].mxu1 %vm211_vm5, %v190_v0 }
  0xfe   :  { %923 = vmatprep.mubr.msk.f32.mxu1 %vm1055_vm1, %v1056_v32 }
 0x101   :  { %924 = vmatmul.mubr.msk.f32.gmra.mrb[2].mxu1 %vm211_vm5, %v191_v1 }
 0x102   :  { %926 = vmatprep.mubr.msk.f32.mxu1 %vm1055_vm1, %v1056_v32 }
 0x105   :  { %927 = vmatmul.mubr.msk.f32.gmra.mrb[4].mxu1 %vm211_vm5, %v192_v2 }
 0x106   :  { %957 = vmatprep.mubr.msk.f32.mxu1 %vm331_vm6, %v552_v49 }
 0x1d0   :  { %v291_v5 = vpop.f32.mrb[0].mxu1 }
 0x1d1   :  { %v292_v6 = vadd.f32 %v291_v5, %v199_v4  ;;  %v922_v7 = vpop.f32.mrb[1].mxu1 }
 0x1d3   :  { %v305_v8 = vmul.f32 0.5, %v292_v6 }
 0x1d4   :  { %v296_v10 = vpop.f32.mrb[2].mxu1 }
 0x1d5   :  { %1029 = vtanh.f32 %v305_v8  ;;  %v297_v11 = vadd.f32 %v296_v10, %v204_v9  ;;  %v925_v12 = vpop.f32.mrb[3].mxu1 }
 0x1d6   :  { %v554_v12 = vld [vmem:[%s1331_s9 + $0x10] sm:$0xff] }
 0x1d7   :  { %v306_v13 = vmul.f32 0.5, %v297_v11  ;;  %v553_v11 = vld [vmem:[%s1331_s9 + $0x8] sm:$0xff] }
 0x1d8   :  { %v301_v15 = vpop.f32.mrb[4].mxu1 }
 0x1d9   :  { %1031 = vtanh.f32 %v306_v13  ;;  %v302_v16 = vadd.f32 %v301_v15, %v209_v14  ;;  %v928_v17 = vpop.f32.mrb[5].mxu1  ;;  %v555_v13 = vld [vmem:[%s1331_s9 + $0x18] sm:$0x3f]  ;;  %v696_v14 = vld [vmem:[%s1332_s11] sm:$0xff]  ;;  %v568_v15 = vpop.permute.xlu1 %567 }
 0x1db   :  { %v307_v18 = vmul.f32 0.5, %v302_v16  ;;  %v563_v16 = vpop.permute.xlu0 %562 }
 0x1dd   :  { %1033 = vtanh.f32 %v307_v18 }
 0x1df   :  { %v1030_v19 = vpop.eup %1029 }
 0x1e0   :  { %v311_v20 = vmul.f32 0.5, %v1030_v19 }
 0x1e2   :  { %v314_v23 = vadd.f32 0.5, %v311_v20 }
 0x1e3   :  { %v1032_v21 = vpop.eup %1031 }
 0x1e4   :  { %v312_v22 = vmul.f32 0.5, %v1032_v21 }
 0x1e6   :  { %v315_v24 = vadd.f32 0.5, %v312_v22  ;;  %v578_v22 = vpop.permute.xlu1 %577 }
 0x1e7   :  { %v1034_v25 = vpop.eup %1033 }
 0x1e8   :  { %v313_v26 = vmul.f32 0.5, %v1034_v25  ;;  %v992_v27 = vpack.c.bf16 %v315_v24, %v314_v23  ;;  %v573_v25 = vpop.permute.xlu0 %572 }
 0x1ea   :  { %v316_v28 = vadd.f32 0.5, %v313_v26  ;;  %993 = vmatprep.subr.bf16.mxu0 %v992_v27  ;;  %v712_v62 = vpop.permute.xlu1 %711 }
 0x1eb   :  { %995 = vmatpush3.bf16.msra.mxu0 %v992_v27 }
 0x1ec   :  { %933 = vmatprep.subr.msk.mxu0 %vm338_vm7, %v316_v28  ;;  %v707_v49 = vpop.permute.xlu0 %706 }
 0x1ef   :  { %934 = vmatpush3.msk.msra.mxu0 %vm338_vm7, %v316_v28 }
 0x1f0   :  { %936 = vmatmul.mubr.msk.f32.vlgmr.msra.gmra.mrb[4].mxu0 %vm331_vm6, %v318_v29  ;;  %996 = vmatprep.subr.bf16.mxu0 %v1054_v31 }
 0x1f1   :  { %942 = vmatprep.mubr.msk.f32.mxu0 %vm1055_vm1, %v1056_v32 }
 0x2c3   :  { %v937_v33 = vpop.f32.mrb[4].mxu0 }
 0x2c4   :  { %v414_v35 = vadd.f32 %v937_v33, %v329_v30  ;;  %v408_v36 = vpop.f32.mrb[5].mxu0 }
 0x2c5   :  { %v409_v37 = vadd.f32 %v408_v36, %v324_v34 }
 0x2c6   :  { %v418_v38 = vmul.f32 0.5, %v414_v35 }
 0x2c7   :  { %v417_v39 = vmul.f32 0.5, %v409_v37 }
 0x2c8   :  { %1035 = vtanh.f32 %v418_v38 }
 0x2c9   :  { %1037 = vtanh.f32 %v417_v39 }
 0x2d2   :  { %v1036_v40 = vpop.eup %1035 }
 0x2d3   :  { %v1038_v41 = vpop.eup %1037  ;;  %v422_v42 = vmul.f32 0.5, %v1036_v40 }
 0x2d4   :  { %v421_v43 = vmul.f32 0.5, %v1038_v41 }
 0x2d5   :  { %v424_v44 = vadd.f32 0.5, %v422_v42 }
 0x2d6   :  { %v423_v31 = vadd.f32 0.5, %v421_v43 }
 0x2d8   :  { %v997_v45 = vpack.c.bf16 %v424_v44, %v423_v31 }
 0x2da   :  { %999 = vmatpush3.bf16.msk.msra.mxu0 %vm998_vm9, %v997_v45 }
 0x2dd   :  { %943 = vmatmul.mubr.msk.f32.vlgmr.msra.gmra.mrb[6].mxu0 %vm446_vm10, %v425_v46  ;;  %v697_v46 = vld [vmem:[%s1332_s11 + $0x8] sm:$0xff] }
 0x2de   :  { %945 = vmatprep.mubr.msk.f32.mxu0 %vm1055_vm1, %v1056_v32 }
 0x2e1   :  { %946 = vmatmul.mubr.msk.f32.gmra.mrb[8].mxu0 %vm446_vm10, %v426_v47  ;;  %v698_v47 = vld [vmem:[%s1332_s11 + $0x10] sm:$0xff] }
 0x2e2   :  { %948 = vmatprep.mubr.msk.f32.mxu0 %vm1055_vm1, %v1056_v32 }
 0x2e5   :  { %949 = vmatmul.mubr.msk.f32.gmra.mrb[10].mxu0 %vm446_vm10, %v427_v48  ;;  %v699_v48 = vld [vmem:[%s1332_s11 + $0x18] sm:$0xff] }
 0x3b0   :  { %v526_v51 = vpop.f32.mrb[6].mxu0 }
 0x3b1   :  { %v527_v52 = vadd.f32 %v526_v51, %v434_v50  ;;  %v944_v53 = vpop.f32.mrb[7].mxu0 }
 0x3b3   :  { %v540_v54 = vmul.f32 0.5, %v527_v52 }
 0x3b4   :  { %v531_v56 = vpop.f32.mrb[8].mxu0 }
 0x3b5   :  { %1039 = vtanh.f32 %v540_v54  ;;  %v532_v32 = vadd.f32 %v531_v56, %v439_v55  ;;  %v947_v57 = vpop.f32.mrb[9].mxu0  ;;  %v722_v54 = vpop.permute.xlu1 %721 }
 0x3b6   :  { %v717_v56 = vpop.permute.xlu0 %716 }
 0x3b7   :  { %v541_v58 = vmul.f32 0.5, %v532_v32 }
 0x3b8   :  { %v536_v60 = vpop.f32.mrb[10].mxu0 }
 0x3b9   :  { %1041 = vtanh.f32 %v541_v58  ;;  %v537_v61 = vadd.f32 %v536_v60, %v444_v59  ;;  %v950_v63 = vpop.f32.mrb[11].mxu0 }
 0x3bb   :  { %v542_v0 = vmul.f32 0.5, %v537_v61 }
 0x3bd   :  { %1043 = vtanh.f32 %v542_v0 }
 0x3bf   :  { %v1040_v1 = vpop.eup %1039 }
 0x3c0   :  { %v546_v2 = vmul.f32 0.5, %v1040_v1 }
 0x3c2   :  { %v549_v5 = vadd.f32 0.5, %v546_v2 }
 0x3c3   :  { %v1042_v3 = vpop.eup %1041 }
 0x3c4   :  { %v547_v4 = vmul.f32 0.5, %v1042_v3 }
 0x3c6   :  { %v550_v6 = vadd.f32 0.5, %v547_v4 }
 0x3c7   :  { %v1044_v7 = vpop.eup %1043 }
 0x3c8   :  { %v548_v8 = vmul.f32 0.5, %v1044_v7  ;;  %v1000_v9 = vpack.c.bf16 %v550_v6, %v549_v5 }
 0x3ca   :  { %v551_v10 = vadd.f32 0.5, %v548_v8  ;;  %1001 = vmatprep.subr.bf16.mxu1 %v1000_v9 }
 0x3cb   :  { %1003 = vmatpush3.bf16.msra.mxu1 %v1000_v9 }
 0x3cc   :  { %955 = vmatprep.subr.msk.mxu1 %vm338_vm7, %v551_v10 }
 0x3cf   :  { %956 = vmatpush3.msk.msra.mxu1 %vm338_vm7, %v551_v10 }
 0x3d0   :  { %958 = vmatmul.mubr.msk.f32.vlgmr.msra.gmra.mrb[6].mxu1 %vm331_vm6, %v553_v11 }
 0x3d1   :  { %960 = vmatprep.mubr.msk.f32.mxu1 %vm331_vm6, %v554_v12 }
 0x3d4   :  { %961 = vmatmul.mubr.msk.f32.gmra.mrb[8].mxu1 %vm331_vm6, %v555_v13 }
 0x3d5   :  { %971 = vmatprep.mubr.msk.f32.mxu1 %vm211_vm5, %v696_v14 }
 0x4a3   :  { %v959_v17 = vpop.f32.mrb[6].mxu1 }
 0x4a4   :  { %v667_v18 = vadd.f32 %v959_v17, %v568_v15  ;;  %v661_v19 = vpop.f32.mrb[7].mxu1 }
 0x4a5   :  { %v662_v20 = vadd.f32 %v661_v19, %v563_v16 }
 0x4a6   :  { %v681_v21 = vmul.f32 0.5, %v667_v18 }
 0x4a7   :  { %v680_v23 = vmul.f32 0.5, %v662_v20  ;;  %v962_v24 = vpop.f32.mrb[8].mxu1 }
 0x4a8   :  { %1045 = vtanh.f32 %v681_v21  ;;  %v677_v26 = vadd.f32 %v962_v24, %v578_v22  ;;  %v671_v27 = vpop.f32.mrb[9].mxu1 }
 0x4a9   :  { %1047 = vtanh.f32 %v680_v23  ;;  %v672_v28 = vadd.f32 %v671_v27, %v573_v25 }
 0x4aa   :  { %v683_v29 = vmul.f32 0.5, %v677_v26 }
 0x4ab   :  { %v682_v30 = vmul.f32 0.5, %v672_v28 }
 0x4ac   :  { %1049 = vtanh.f32 %v683_v29 }
 0x4ad   :  { %1051 = vtanh.f32 %v682_v30 }
 0x4b2   :  { %v1046_v33 = vpop.eup %1045 }
 0x4b3   :  { %v1048_v34 = vpop.eup %1047  ;;  %v689_v35 = vmul.f32 0.5, %v1046_v33 }
 0x4b4   :  { %v688_v36 = vmul.f32 0.5, %v1048_v34 }
 0x4b5   :  { %v693_v37 = vadd.f32 0.5, %v689_v35 }
 0x4b6   :  { %v1050_v38 = vpop.eup %1049  ;;  %v692_v39 = vadd.f32 0.5, %v688_v36 }
 0x4b7   :  { %v1052_v40 = vpop.eup %1051  ;;  %v691_v41 = vmul.f32 0.5, %v1050_v38 }
 0x4b8   :  { %v690_v42 = vmul.f32 0.5, %v1052_v40  ;;  %v1004_v43 = vpack.c.bf16 %v693_v37, %v692_v39 }
 0x4b9   :  { %v695_v44 = vadd.f32 0.5, %v691_v41 }
 0x4ba   :  { %v694_v31 = vadd.f32 0.5, %v690_v42  ;;  %1005 = vmatprep.subr.bf16.mxu1 %v1004_v43 }
 0x4bb   :  { %1007 = vmatpush3.bf16.msra.mxu1 %v1004_v43 }
 0x4bc   :  { %v1008_v45 = vpack.c.bf16 %v695_v44, %v694_v31 }
 0x4be   :  { %1010 = vmatprep.subr.msk.bf16.mxu1 %vm1221_vm4, %v1008_v45 }
 0x4bf   :  { %1013 = vmatpush3.bf16.msk.msra.mxu1 %vm1221_vm4, %v1008_v45 }
 0x4c2   :  { %972 = vmatmul.mubr.msk.f32.vlgmr.msra.gmra.mrb[10].mxu1 %vm211_vm5, %v697_v46 }
 0x4c3   :  { %974 = vmatprep.mubr.msk.f32.mxu1 %vm211_vm5, %v698_v47 }
 0x4c6   :  { %975 = vmatmul.mubr.msk.f32.gmra.mrb[12].mxu1 %vm211_vm5, %v699_v48 }
 0x595   :  { %v973_v50 = vpop.f32.mrb[10].mxu1 }
 0x596   :  { %v811_v51 = vadd.f32 %v973_v50, %v712_v62  ;;  %v805_v52 = vpop.f32.mrb[11].mxu1 }
 0x597   :  { %v806_v53 = vadd.f32 %v805_v52, %v707_v49 }
 0x598   :  { %826 = vst.msk [vmem:[%s1333_s13 + $0x8] sm:$0xff] %vm824_vm11, %v811_v51 }
 0x599   :  { %825 = vst.msk [vmem:[%s1333_s13] sm:$0xff] %vm824_vm11, %v806_v53  ;;  %v976_v55 = vpop.f32.mrb[12].mxu1 }
 0x59a   :  { %v821_v32 = vadd.f32 %v976_v55, %v722_v54  ;;  %v815_v57 = vpop.f32.mrb[13].mxu1 }
 0x59b   :  { %v816_v58 = vadd.f32 %v815_v57, %v717_v56 }
 0x59c   :  { %828 = vst.msk [vmem:[%s1333_s13 + $0x18] sm:$0xff] %vm824_vm11, %v821_v32 }
 0x59d   :  { %827 = vst.msk [vmem:[%s1333_s13 + $0x10] sm:$0xff] %vm824_vm11, %v816_v58 }

</bundles_post_ra>
